<compile_context>
chip_gen: v5e
topology: v5e:2x2
jax: 0.10.0
libtpu: 0.0.40
codegen_flags: <defaults>
</compile_context>

<pallas_src>
import functools

import jax
import jax.numpy as jnp
from jax import lax
from jax.experimental import pallas as pl
from jax.experimental.pallas import tpu as pltpu


def _bilstm_tag_kernel(x_ref, h0_ref, c0_ref,
                       wih_ref, whh_ref, b_ref,
                       wout_ref, bout_ref,
                       out_ref,
                       hcat_ref,
                       *, T, Bp, H):
    """Fused bidirectional LSTM + tag head.

    x_ref:    (T*Bp, 2E)  time-major, per-step [x(t) | x(T-1-t)]
    h0/c0:    (Bp, 2H)    lane-concatenated [fwd | bwd] initial state
    wih_ref:  (2E, 8H)    block-structured input weights, gate lanes
                          [i_f,i_b,f_f,f_b,o_f,o_b,g_f,g_b]
    whh_ref:  (2H, 8H)    block-diagonal recurrent weights (same lane order)
    b_ref:    (1, 8H)     combined ih+hh biases (same lane order)
    wout_ref: (2H, Lp)    tag head, padded to lane-dense Lp
    bout_ref: (1, Lp)
    out_ref:  (T*Bp, Lp)  time-major flattened, lane-dense output slab
    hcat_ref: (T*Bp, 2H)  VMEM scratch: time-aligned [h_fwd(t) | h_bwd(t)]
    """
    H2 = 2 * H

    # ---- input projection for all steps & both directions, biases folded in ----
    gx_all = (jnp.dot(x_ref[...], wih_ref[...],
                      preferred_element_type=jnp.float32)
              + b_ref[...])                               # (T*Bp, 8H)

    whh = whh_ref[...]
    h = h0_ref[...]                                       # (Bp, 2H) = [h_f | h_b]
    c = c0_ref[...]

    # ---- fully-unrolled fused recurrence (fwd step s, bwd step T-1-s) ----
    for s in range(T):
        gx = gx_all[s * Bp:(s + 1) * Bp, :]               # already direction-correct
        gates = gx + jnp.dot(h, whh, preferred_element_type=jnp.float32)
        ifo = jax.nn.sigmoid(gates[:, 0:3 * H2])          # one EUP pass (i, f, o)
        g = jnp.tanh(gates[:, 3 * H2:4 * H2])             # one EUP pass (g)
        i = ifo[:, 0:H2]
        f = ifo[:, H2:2 * H2]
        o = ifo[:, 2 * H2:3 * H2]
        c = f * c + i * g
        h = o * jnp.tanh(c)
        # time-aligned per-step stores (overlap the recurrence on the vst slot)
        hcat_ref[s * Bp:(s + 1) * Bp, 0:H] = h[:, 0:H]
        hcat_ref[(T - 1 - s) * Bp:(T - s) * Bp, H:2 * H] = h[:, H:2 * H]

    # ---- one fused tag-head matmul over the already time-aligned slab ----
    y = (jnp.dot(hcat_ref[...], wout_ref[...], preferred_element_type=jnp.float32)
         + bout_ref[...])
    out_ref[...] = y.astype(out_ref.dtype)


def _pack_params(params, E, H, L, Lp):
    """Repack per-direction params into the fused kernel layout.

    Fused gate order is [i, f, o, g] (sigmoid gates first, tanh last); within each
    gate the fwd direction occupies the first H lanes and bwd the next H lanes.
    """
    order = (0, 1, 3, 2)  # torch gate order i,f,g,o  ->  fused i,f,o,g

    wih_aug = jnp.zeros((2 * E, 8 * H), jnp.float32)
    whh_blk = jnp.zeros((2 * H, 8 * H), jnp.float32)
    b_cols = []
    for j, k in enumerate(order):
        # fwd-gate columns read x(t) rows (0:E); bwd-gate columns read x(T-1-t) rows (E:2E)
        wih_aug = wih_aug.at[0:E, (2 * j) * H:(2 * j + 1) * H].set(
            params["wih_f"][:, k * H:(k + 1) * H])
        wih_aug = wih_aug.at[E:2 * E, (2 * j + 1) * H:(2 * j + 2) * H].set(
            params["wih_b"][:, k * H:(k + 1) * H])
        # block-diagonal recurrent weights
        whh_blk = whh_blk.at[0:H, (2 * j) * H:(2 * j + 1) * H].set(
            params["whh_f"][:, k * H:(k + 1) * H])
        whh_blk = whh_blk.at[H:2 * H, (2 * j + 1) * H:(2 * j + 2) * H].set(
            params["whh_b"][:, k * H:(k + 1) * H])
        b_cols.append(params["b_f"][:, k * H:(k + 1) * H])
        b_cols.append(params["b_b"][:, k * H:(k + 1) * H])
    b_cat = jnp.concatenate(b_cols, axis=1)               # (1, 8H)

    wout_pad = jnp.zeros((2 * H, Lp), jnp.float32).at[:, :L].set(params["wout"])
    bout_pad = jnp.zeros((1, Lp), jnp.float32).at[:, :L].set(params["bout"])
    return wih_aug, whh_blk, b_cat, wout_pad, bout_pad


def simple_lstm_forward(x, params, h0, c0):
    """x: (B, T, E) batch_first.  Returns tag scores (B, T, nb_labels)."""
    B, T, E = x.shape
    H = params["whh_f"].shape[0]
    L = params["wout"].shape[1]
    Bp = ((B + 7) // 8) * 8                               # full f32 sublane tile
    Lp = ((L + 127) // 128) * 128                         # lane-dense output width

    wih_aug, whh_blk, b_cat, wout_pad, bout_pad = _pack_params(params, E, H, L, Lp)

    # time-major; per step stack [x(t) | x(T-1-t)] so one matmul serves both directions
    x_tm = jnp.transpose(x, (1, 0, 2))                    # (T, B, E)
    x_aug = jnp.concatenate([x_tm, x_tm[::-1]], axis=-1)  # (T, B, 2E)
    x_aug = jnp.pad(x_aug, ((0, 0), (0, Bp - B), (0, 0)))  # pad batch to sublane tile
    x_flat = x_aug.reshape(T * Bp, 2 * E)

    h0_cat = jnp.pad(jnp.concatenate([h0[0], h0[1]], axis=-1), ((0, Bp - B), (0, 0)))
    c0_cat = jnp.pad(jnp.concatenate([c0[0], c0[1]], axis=-1), ((0, Bp - B), (0, 0)))

    flops = (2 * (T * Bp) * (2 * E) * (8 * H)             # input projection
             + T * 2 * Bp * (2 * H) * (8 * H)             # recurrence
             + 2 * (T * Bp) * (2 * H) * Lp                # tag head
             + 10 * T * Bp * H)                           # elementwise
    transcendentals = T * Bp * 10 * H                     # sigmoid(6H) + tanh(2H) + tanh(c)(2H)
    bytes_accessed = 4 * (x_flat.size + h0_cat.size + c0_cat.size + wih_aug.size
                          + whh_blk.size + b_cat.size + wout_pad.size + bout_pad.size
                          + T * Bp * Lp)
    cost = pl.CostEstimate(flops=flops, transcendentals=transcendentals,
                           bytes_accessed=bytes_accessed)

    kernel = functools.partial(_bilstm_tag_kernel, T=T, Bp=Bp, H=H)
    out_flat = pl.pallas_call(
        kernel,
        out_shape=jax.ShapeDtypeStruct((T * Bp, Lp), jnp.float32),
        in_specs=[pl.BlockSpec(memory_space=pltpu.MemorySpace.VMEM)] * 8,
        out_specs=pl.BlockSpec(memory_space=pltpu.MemorySpace.VMEM),
        scratch_shapes=[pltpu.VMEM((T * Bp, 2 * H), jnp.float32)],
        cost_estimate=cost,
    )(x_flat, h0_cat, c0_cat, wih_aug, whh_blk, b_cat, wout_pad, bout_pad)

    out = out_flat[:, :L].reshape(T, Bp, L)[:, :B, :]
    return jnp.transpose(out, (1, 0, 2))


def init_params(key, emb_dim, hidden_dim, nb_labels):
    """Deterministic init matching PyTorch shapes (LSTM gate order i,f,g,o)."""
    H = hidden_dim // 2
    keys = jax.random.split(key, 10)

    def u(k_, shape, scale):
        return jax.random.uniform(k_, shape, jnp.float32, -scale, scale)

    k_lstm = 1.0 / float(H) ** 0.5
    wih_f = u(keys[0], (4 * H, emb_dim), k_lstm)
    whh_f = u(keys[1], (4 * H, H), k_lstm)
    bih_f = u(keys[2], (4 * H,), k_lstm)
    bhh_f = u(keys[3], (4 * H,), k_lstm)
    wih_b = u(keys[4], (4 * H, emb_dim), k_lstm)
    whh_b = u(keys[5], (4 * H, H), k_lstm)
    bih_b = u(keys[6], (4 * H,), k_lstm)
    bhh_b = u(keys[7], (4 * H,), k_lstm)

    k_lin = 1.0 / float(hidden_dim) ** 0.5
    w_tag = u(keys[8], (nb_labels, hidden_dim), k_lin)
    b_tag = u(keys[9], (nb_labels,), k_lin)

    return dict(
        wih_f=wih_f.T, whh_f=whh_f.T, b_f=(bih_f + bhh_f)[None, :],
        wih_b=wih_b.T, whh_b=whh_b.T, b_b=(bih_b + bhh_b)[None, :],
        wout=w_tag.T, bout=b_tag[None, :],
    )


def reference_forward(x, params, h0, c0):
    """Pure-JAX reference mirroring torch.nn.LSTM(bidirectional) + Linear."""
    def run(xs, h, c, wih, whh, b):
        def step(carry, xt):
            h, c = carry
            gates = xt @ wih + h @ whh + b
            i, f, g, o = jnp.split(gates, 4, axis=-1)
            i, f, o = jax.nn.sigmoid(i), jax.nn.sigmoid(f), jax.nn.sigmoid(o)
            g = jnp.tanh(g)
            c = f * c + i * g
            h = o * jnp.tanh(c)
            return (h, c), h
        _, hs = lax.scan(step, (h, c), xs)
        return hs

    x_tm = jnp.transpose(x, (1, 0, 2))
    hf = run(x_tm, h0[0], c0[0], params["wih_f"], params["whh_f"], params["b_f"])
    hb = run(x_tm[::-1], h0[1], c0[1],
             params["wih_b"], params["whh_b"], params["b_b"])[::-1]
    hcat = jnp.concatenate([hf, hb], axis=-1)
    out = hcat @ params["wout"] + params["bout"]
    return jnp.transpose(out, (1, 0, 2))


if __name__ == "__main__":
    B, T, EMB, HID, LABELS = 2, 8, 16, 32, 5
    H = HID // 2

    key = jax.random.PRNGKey(0)
    kx, kp, kh, kc = jax.random.split(key, 4)

    x = jax.random.normal(kx, (B, T, EMB), jnp.float32)      # batch_first sentences
    params = init_params(kp, EMB, HID, LABELS)
    h0 = jax.random.normal(kh, (2, B, H), jnp.float32)       # init_hidden (randn), fixed seed
    c0 = jax.random.normal(kc, (2, B, H), jnp.float32)

    out = simple_lstm_forward(x, params, h0, c0)
    out = jax.block_until_ready(out)

    ref = reference_forward(x, params, h0, c0)
    assert out.shape == (B, T, LABELS)
    assert jnp.allclose(out, ref, atol=1e-4, rtol=1e-4), \
        float(jnp.max(jnp.abs(out - ref)))

    print("KERNEL_OK")
</pallas_src>

<mosaic_0001>
module attributes {stable_mosaic.version = 11 : i64} {
  func.func @_bilstm_tag_kernel(%arg0: memref<64x32xf32, #tpu.memory_space<vmem>>, %arg1: memref<8x32xf32, #tpu.memory_space<vmem>>, %arg2: memref<8x32xf32, #tpu.memory_space<vmem>>, %arg3: memref<32x128xf32, #tpu.memory_space<vmem>>, %arg4: memref<32x128xf32, #tpu.memory_space<vmem>>, %arg5: memref<1x128xf32, #tpu.memory_space<vmem>>, %arg6: memref<32x128xf32, #tpu.memory_space<vmem>>, %arg7: memref<1x128xf32, #tpu.memory_space<vmem>>, %arg8: memref<64x128xf32, #tpu.memory_space<vmem>>, %arg9: memref<64x32xf32, #tpu.memory_space<vmem>>) attributes {dimension_semantics = [], scalar_prefetch = 0 : i64, scratch_operands = 1 : i64, tpu.core_type = #tpu.core_type<tc>} {
    %c0 = arith.constant 0 : index
    %c0_0 = arith.constant 0 : index
    %0 = vector.load %arg0[%c0, %c0_0] : memref<64x32xf32, #tpu.memory_space<vmem>>, vector<64x32xf32>
    %c0_1 = arith.constant 0 : index
    %c0_2 = arith.constant 0 : index
    %1 = vector.load %arg3[%c0_1, %c0_2] : memref<32x128xf32, #tpu.memory_space<vmem>>, vector<32x128xf32>
    %cst = arith.constant dense<0.000000e+00> : vector<64x128xf32>
    %2 = tpu.matmul %0, %1, %cst {dimension_numbers = #tpu.dot_dimension_numbers<[1], [0], [0], [1], [0, 0, 1, 1], [], []>} : vector<64x32xf32>, vector<32x128xf32>, vector<64x128xf32> -> vector<64x128xf32>
    %c0_3 = arith.constant 0 : index
    %c0_4 = arith.constant 0 : index
    %3 = vector.load %arg5[%c0_3, %c0_4] : memref<1x128xf32, #tpu.memory_space<vmem>>, vector<1x128xf32>
    %4 = vector.broadcast %3 : vector<1x128xf32> to vector<64x128xf32>
    %5 = arith.addf %2, %4 : vector<64x128xf32>
    %c0_5 = arith.constant 0 : index
    %c0_6 = arith.constant 0 : index
    %6 = vector.load %arg4[%c0_5, %c0_6] : memref<32x128xf32, #tpu.memory_space<vmem>>, vector<32x128xf32>
    %c0_7 = arith.constant 0 : index
    %c0_8 = arith.constant 0 : index
    %7 = vector.load %arg1[%c0_7, %c0_8] : memref<8x32xf32, #tpu.memory_space<vmem>>, vector<8x32xf32>
    %c0_9 = arith.constant 0 : index
    %c0_10 = arith.constant 0 : index
    %8 = vector.load %arg2[%c0_9, %c0_10] : memref<8x32xf32, #tpu.memory_space<vmem>>, vector<8x32xf32>
    %9 = vector.extract_strided_slice %5 {offsets = [0, 0], sizes = [8, 128], strides = [1, 1]} : vector<64x128xf32> to vector<8x128xf32>
    %cst_11 = arith.constant dense<0.000000e+00> : vector<8x128xf32>
    %10 = tpu.matmul %7, %6, %cst_11 {dimension_numbers = #tpu.dot_dimension_numbers<[1], [0], [0], [1], [0, 0, 1, 1], [], []>} : vector<8x32xf32>, vector<32x128xf32>, vector<8x128xf32> -> vector<8x128xf32>
    %11 = arith.addf %9, %10 : vector<8x128xf32>
    %12 = vector.extract_strided_slice %11 {offsets = [0, 0], sizes = [8, 96], strides = [1, 1]} : vector<8x128xf32> to vector<8x96xf32>
    %13 = arith.negf %12 : vector<8x96xf32>
    %14 = math.exp %13 : vector<8x96xf32>
    %cst_12 = arith.constant 1.000000e+00 : f32
    %15 = vector.broadcast %cst_12 : f32 to vector<8x96xf32>
    %16 = arith.addf %15, %14 : vector<8x96xf32>
    %17 = arith.divf %15, %16 : vector<8x96xf32>
    %18 = vector.extract_strided_slice %11 {offsets = [0, 96], sizes = [8, 32], strides = [1, 1]} : vector<8x128xf32> to vector<8x32xf32>
    %19 = math.tanh %18 : vector<8x32xf32>
    %20 = vector.extract_strided_slice %17 {offsets = [0, 0], sizes = [8, 32], strides = [1, 1]} : vector<8x96xf32> to vector<8x32xf32>
    %21 = vector.extract_strided_slice %17 {offsets = [0, 32], sizes = [8, 32], strides = [1, 1]} : vector<8x96xf32> to vector<8x32xf32>
    %22 = vector.extract_strided_slice %17 {offsets = [0, 64], sizes = [8, 32], strides = [1, 1]} : vector<8x96xf32> to vector<8x32xf32>
    %23 = arith.mulf %21, %8 : vector<8x32xf32>
    %24 = arith.mulf %20, %19 : vector<8x32xf32>
    %25 = arith.addf %23, %24 : vector<8x32xf32>
    %26 = math.tanh %25 : vector<8x32xf32>
    %27 = arith.mulf %22, %26 : vector<8x32xf32>
    %28 = vector.extract_strided_slice %27 {offsets = [0, 0], sizes = [8, 16], strides = [1, 1]} : vector<8x32xf32> to vector<8x16xf32>
    %c0_13 = arith.constant 0 : index
    %c0_14 = arith.constant 0 : index
    %29 = vector.load %arg9[%c0_13, %c0_14] : memref<64x32xf32, #tpu.memory_space<vmem>>, vector<8x16xf32>
    tpu.vector_store %arg9[%c0_13, %c0_14], %28 {strides = array<i32>} : memref<64x32xf32, #tpu.memory_space<vmem>>, vector<8x16xf32>,
    %30 = vector.extract_strided_slice %27 {offsets = [0, 16], sizes = [8, 16], strides = [1, 1]} : vector<8x32xf32> to vector<8x16xf32>
    %c56 = arith.constant 56 : index
    %c16 = arith.constant 16 : index
    %31 = vector.load %arg9[%c56, %c16] : memref<64x32xf32, #tpu.memory_space<vmem>>, vector<8x16xf32>
    tpu.vector_store %arg9[%c56, %c16], %30 {strides = array<i32>} : memref<64x32xf32, #tpu.memory_space<vmem>>, vector<8x16xf32>,
    %32 = vector.extract_strided_slice %5 {offsets = [8, 0], sizes = [8, 128], strides = [1, 1]} : vector<64x128xf32> to vector<8x128xf32>
    %cst_15 = arith.constant dense<0.000000e+00> : vector<8x128xf32>
    %33 = tpu.matmul %27, %6, %cst_15 {dimension_numbers = #tpu.dot_dimension_numbers<[1], [0], [0], [1], [0, 0, 1, 1], [], []>} : vector<8x32xf32>, vector<32x128xf32>, vector<8x128xf32> -> vector<8x128xf32>
    %34 = arith.addf %32, %33 : vector<8x128xf32>
    %35 = vector.extract_strided_slice %34 {offsets = [0, 0], sizes = [8, 96], strides = [1, 1]} : vector<8x128xf32> to vector<8x96xf32>
    %36 = arith.negf %35 : vector<8x96xf32>
    %37 = math.exp %36 : vector<8x96xf32>
    %cst_16 = arith.constant 1.000000e+00 : f32
    %38 = vector.broadcast %cst_16 : f32 to vector<8x96xf32>
    %39 = arith.addf %38, %37 : vector<8x96xf32>
    %40 = arith.divf %38, %39 : vector<8x96xf32>
    %41 = vector.extract_strided_slice %34 {offsets = [0, 96], sizes = [8, 32], strides = [1, 1]} : vector<8x128xf32> to vector<8x32xf32>
    %42 = math.tanh %41 : vector<8x32xf32>
    %43 = vector.extract_strided_slice %40 {offsets = [0, 0], sizes = [8, 32], strides = [1, 1]} : vector<8x96xf32> to vector<8x32xf32>
    %44 = vector.extract_strided_slice %40 {offsets = [0, 32], sizes = [8, 32], strides = [1, 1]} : vector<8x96xf32> to vector<8x32xf32>
    %45 = vector.extract_strided_slice %40 {offsets = [0, 64], sizes = [8, 32], strides = [1, 1]} : vector<8x96xf32> to vector<8x32xf32>
    %46 = arith.mulf %44, %25 : vector<8x32xf32>
    %47 = arith.mulf %43, %42 : vector<8x32xf32>
    %48 = arith.addf %46, %47 : vector<8x32xf32>
    %49 = math.tanh %48 : vector<8x32xf32>
    %50 = arith.mulf %45, %49 : vector<8x32xf32>
    %51 = vector.extract_strided_slice %50 {offsets = [0, 0], sizes = [8, 16], strides = [1, 1]} : vector<8x32xf32> to vector<8x16xf32>
    %c8 = arith.constant 8 : index
    %c0_17 = arith.constant 0 : index
    %52 = vector.load %arg9[%c8, %c0_17] : memref<64x32xf32, #tpu.memory_space<vmem>>, vector<8x16xf32>
    tpu.vector_store %arg9[%c8, %c0_17], %51 {strides = array<i32>} : memref<64x32xf32, #tpu.memory_space<vmem>>, vector<8x16xf32>,
    %53 = vector.extract_strided_slice %50 {offsets = [0, 16], sizes = [8, 16], strides = [1, 1]} : vector<8x32xf32> to vector<8x16xf32>
    %c48 = arith.constant 48 : index
    %c16_18 = arith.constant 16 : index
    %54 = vector.load %arg9[%c48, %c16_18] : memref<64x32xf32, #tpu.memory_space<vmem>>, vector<8x16xf32>
    tpu.vector_store %arg9[%c48, %c16_18], %53 {strides = array<i32>} : memref<64x32xf32, #tpu.memory_space<vmem>>, vector<8x16xf32>,
    %55 = vector.extract_strided_slice %5 {offsets = [16, 0], sizes = [8, 128], strides = [1, 1]} : vector<64x128xf32> to vector<8x128xf32>
    %cst_19 = arith.constant dense<0.000000e+00> : vector<8x128xf32>
    %56 = tpu.matmul %50, %6, %cst_19 {dimension_numbers = #tpu.dot_dimension_numbers<[1], [0], [0], [1], [0, 0, 1, 1], [], []>} : vector<8x32xf32>, vector<32x128xf32>, vector<8x128xf32> -> vector<8x128xf32>
    %57 = arith.addf %55, %56 : vector<8x128xf32>
    %58 = vector.extract_strided_slice %57 {offsets = [0, 0], sizes = [8, 96], strides = [1, 1]} : vector<8x128xf32> to vector<8x96xf32>
    %59 = arith.negf %58 : vector<8x96xf32>
    %60 = math.exp %59 : vector<8x96xf32>
    %cst_20 = arith.constant 1.000000e+00 : f32
    %61 = vector.broadcast %cst_20 : f32 to vector<8x96xf32>
    %62 = arith.addf %61, %60 : vector<8x96xf32>
    %63 = arith.divf %61, %62 : vector<8x96xf32>
    %64 = vector.extract_strided_slice %57 {offsets = [0, 96], sizes = [8, 32], strides = [1, 1]} : vector<8x128xf32> to vector<8x32xf32>
    %65 = math.tanh %64 : vector<8x32xf32>
    %66 = vector.extract_strided_slice %63 {offsets = [0, 0], sizes = [8, 32], strides = [1, 1]} : vector<8x96xf32> to vector<8x32xf32>
    %67 = vector.extract_strided_slice %63 {offsets = [0, 32], sizes = [8, 32], strides = [1, 1]} : vector<8x96xf32> to vector<8x32xf32>
    %68 = vector.extract_strided_slice %63 {offsets = [0, 64], sizes = [8, 32], strides = [1, 1]} : vector<8x96xf32> to vector<8x32xf32>
    %69 = arith.mulf %67, %48 : vector<8x32xf32>
    %70 = arith.mulf %66, %65 : vector<8x32xf32>
    %71 = arith.addf %69, %70 : vector<8x32xf32>
    %72 = math.tanh %71 : vector<8x32xf32>
    %73 = arith.mulf %68, %72 : vector<8x32xf32>
    %74 = vector.extract_strided_slice %73 {offsets = [0, 0], sizes = [8, 16], strides = [1, 1]} : vector<8x32xf32> to vector<8x16xf32>
    %c16_21 = arith.constant 16 : index
    %c0_22 = arith.constant 0 : index
    %75 = vector.load %arg9[%c16_21, %c0_22] : memref<64x32xf32, #tpu.memory_space<vmem>>, vector<8x16xf32>
    tpu.vector_store %arg9[%c16_21, %c0_22], %74 {strides = array<i32>} : memref<64x32xf32, #tpu.memory_space<vmem>>, vector<8x16xf32>,
    %76 = vector.extract_strided_slice %73 {offsets = [0, 16], sizes = [8, 16], strides = [1, 1]} : vector<8x32xf32> to vector<8x16xf32>
    %c40 = arith.constant 40 : index
    %c16_23 = arith.constant 16 : index
    %77 = vector.load %arg9[%c40, %c16_23] : memref<64x32xf32, #tpu.memory_space<vmem>>, vector<8x16xf32>
    tpu.vector_store %arg9[%c40, %c16_23], %76 {strides = array<i32>} : memref<64x32xf32, #tpu.memory_space<vmem>>, vector<8x16xf32>,
    %78 = vector.extract_strided_slice %5 {offsets = [24, 0], sizes = [8, 128], strides = [1, 1]} : vector<64x128xf32> to vector<8x128xf32>
    %cst_24 = arith.constant dense<0.000000e+00> : vector<8x128xf32>
    %79 = tpu.matmul %73, %6, %cst_24 {dimension_numbers = #tpu.dot_dimension_numbers<[1], [0], [0], [1], [0, 0, 1, 1], [], []>} : vector<8x32xf32>, vector<32x128xf32>, vector<8x128xf32> -> vector<8x128xf32>
    %80 = arith.addf %78, %79 : vector<8x128xf32>
    %81 = vector.extract_strided_slice %80 {offsets = [0, 0], sizes = [8, 96], strides = [1, 1]} : vector<8x128xf32> to vector<8x96xf32>
    %82 = arith.negf %81 : vector<8x96xf32>
    %83 = math.exp %82 : vector<8x96xf32>
    %cst_25 = arith.constant 1.000000e+00 : f32
    %84 = vector.broadcast %cst_25 : f32 to vector<8x96xf32>
    %85 = arith.addf %84, %83 : vector<8x96xf32>
    %86 = arith.divf %84, %85 : vector<8x96xf32>
    %87 = vector.extract_strided_slice %80 {offsets = [0, 96], sizes = [8, 32], strides = [1, 1]} : vector<8x128xf32> to vector<8x32xf32>
    %88 = math.tanh %87 : vector<8x32xf32>
    %89 = vector.extract_strided_slice %86 {offsets = [0, 0], sizes = [8, 32], strides = [1, 1]} : vector<8x96xf32> to vector<8x32xf32>
    %90 = vector.extract_strided_slice %86 {offsets = [0, 32], sizes = [8, 32], strides = [1, 1]} : vector<8x96xf32> to vector<8x32xf32>
    %91 = vector.extract_strided_slice %86 {offsets = [0, 64], sizes = [8, 32], strides = [1, 1]} : vector<8x96xf32> to vector<8x32xf32>
    %92 = arith.mulf %90, %71 : vector<8x32xf32>
    %93 = arith.mulf %89, %88 : vector<8x32xf32>
    %94 = arith.addf %92, %93 : vector<8x32xf32>
    %95 = math.tanh %94 : vector<8x32xf32>
    %96 = arith.mulf %91, %95 : vector<8x32xf32>
    %97 = vector.extract_strided_slice %96 {offsets = [0, 0], sizes = [8, 16], strides = [1, 1]} : vector<8x32xf32> to vector<8x16xf32>
    %c24 = arith.constant 24 : index
    %c0_26 = arith.constant 0 : index
    %98 = vector.load %arg9[%c24, %c0_26] : memref<64x32xf32, #tpu.memory_space<vmem>>, vector<8x16xf32>
    tpu.vector_store %arg9[%c24, %c0_26], %97 {strides = array<i32>} : memref<64x32xf32, #tpu.memory_space<vmem>>, vector<8x16xf32>,
    %99 = vector.extract_strided_slice %96 {offsets = [0, 16], sizes = [8, 16], strides = [1, 1]} : vector<8x32xf32> to vector<8x16xf32>
    %c32 = arith.constant 32 : index
    %c16_27 = arith.constant 16 : index
    %100 = vector.load %arg9[%c32, %c16_27] : memref<64x32xf32, #tpu.memory_space<vmem>>, vector<8x16xf32>
    tpu.vector_store %arg9[%c32, %c16_27], %99 {strides = array<i32>} : memref<64x32xf32, #tpu.memory_space<vmem>>, vector<8x16xf32>,
    %101 = vector.extract_strided_slice %5 {offsets = [32, 0], sizes = [8, 128], strides = [1, 1]} : vector<64x128xf32> to vector<8x128xf32>
    %cst_28 = arith.constant dense<0.000000e+00> : vector<8x128xf32>
    %102 = tpu.matmul %96, %6, %cst_28 {dimension_numbers = #tpu.dot_dimension_numbers<[1], [0], [0], [1], [0, 0, 1, 1], [], []>} : vector<8x32xf32>, vector<32x128xf32>, vector<8x128xf32> -> vector<8x128xf32>
    %103 = arith.addf %101, %102 : vector<8x128xf32>
    %104 = vector.extract_strided_slice %103 {offsets = [0, 0], sizes = [8, 96], strides = [1, 1]} : vector<8x128xf32> to vector<8x96xf32>
    %105 = arith.negf %104 : vector<8x96xf32>
    %106 = math.exp %105 : vector<8x96xf32>
    %cst_29 = arith.constant 1.000000e+00 : f32
    %107 = vector.broadcast %cst_29 : f32 to vector<8x96xf32>
    %108 = arith.addf %107, %106 : vector<8x96xf32>
    %109 = arith.divf %107, %108 : vector<8x96xf32>
    %110 = vector.extract_strided_slice %103 {offsets = [0, 96], sizes = [8, 32], strides = [1, 1]} : vector<8x128xf32> to vector<8x32xf32>
    %111 = math.tanh %110 : vector<8x32xf32>
    %112 = vector.extract_strided_slice %109 {offsets = [0, 0], sizes = [8, 32], strides = [1, 1]} : vector<8x96xf32> to vector<8x32xf32>
    %113 = vector.extract_strided_slice %109 {offsets = [0, 32], sizes = [8, 32], strides = [1, 1]} : vector<8x96xf32> to vector<8x32xf32>
    %114 = vector.extract_strided_slice %109 {offsets = [0, 64], sizes = [8, 32], strides = [1, 1]} : vector<8x96xf32> to vector<8x32xf32>
    %115 = arith.mulf %113, %94 : vector<8x32xf32>
    %116 = arith.mulf %112, %111 : vector<8x32xf32>
    %117 = arith.addf %115, %116 : vector<8x32xf32>
    %118 = math.tanh %117 : vector<8x32xf32>
    %119 = arith.mulf %114, %118 : vector<8x32xf32>
    %120 = vector.extract_strided_slice %119 {offsets = [0, 0], sizes = [8, 16], strides = [1, 1]} : vector<8x32xf32> to vector<8x16xf32>
    %c32_30 = arith.constant 32 : index
    %c0_31 = arith.constant 0 : index
    %121 = vector.load %arg9[%c32_30, %c0_31] : memref<64x32xf32, #tpu.memory_space<vmem>>, vector<8x16xf32>
    tpu.vector_store %arg9[%c32_30, %c0_31], %120 {strides = array<i32>} : memref<64x32xf32, #tpu.memory_space<vmem>>, vector<8x16xf32>,
    %122 = vector.extract_strided_slice %119 {offsets = [0, 16], sizes = [8, 16], strides = [1, 1]} : vector<8x32xf32> to vector<8x16xf32>
    %c24_32 = arith.constant 24 : index
    %c16_33 = arith.constant 16 : index
    %123 = vector.load %arg9[%c24_32, %c16_33] : memref<64x32xf32, #tpu.memory_space<vmem>>, vector<8x16xf32>
    tpu.vector_store %arg9[%c24_32, %c16_33], %122 {strides = array<i32>} : memref<64x32xf32, #tpu.memory_space<vmem>>, vector<8x16xf32>,
    %124 = vector.extract_strided_slice %5 {offsets = [40, 0], sizes = [8, 128], strides = [1, 1]} : vector<64x128xf32> to vector<8x128xf32>
    %cst_34 = arith.constant dense<0.000000e+00> : vector<8x128xf32>
    %125 = tpu.matmul %119, %6, %cst_34 {dimension_numbers = #tpu.dot_dimension_numbers<[1], [0], [0], [1], [0, 0, 1, 1], [], []>} : vector<8x32xf32>, vector<32x128xf32>, vector<8x128xf32> -> vector<8x128xf32>
    %126 = arith.addf %124, %125 : vector<8x128xf32>
    %127 = vector.extract_strided_slice %126 {offsets = [0, 0], sizes = [8, 96], strides = [1, 1]} : vector<8x128xf32> to vector<8x96xf32>
    %128 = arith.negf %127 : vector<8x96xf32>
    %129 = math.exp %128 : vector<8x96xf32>
    %cst_35 = arith.constant 1.000000e+00 : f32
    %130 = vector.broadcast %cst_35 : f32 to vector<8x96xf32>
    %131 = arith.addf %130, %129 : vector<8x96xf32>
    %132 = arith.divf %130, %131 : vector<8x96xf32>
    %133 = vector.extract_strided_slice %126 {offsets = [0, 96], sizes = [8, 32], strides = [1, 1]} : vector<8x128xf32> to vector<8x32xf32>
    %134 = math.tanh %133 : vector<8x32xf32>
    %135 = vector.extract_strided_slice %132 {offsets = [0, 0], sizes = [8, 32], strides = [1, 1]} : vector<8x96xf32> to vector<8x32xf32>
    %136 = vector.extract_strided_slice %132 {offsets = [0, 32], sizes = [8, 32], strides = [1, 1]} : vector<8x96xf32> to vector<8x32xf32>
    %137 = vector.extract_strided_slice %132 {offsets = [0, 64], sizes = [8, 32], strides = [1, 1]} : vector<8x96xf32> to vector<8x32xf32>
    %138 = arith.mulf %136, %117 : vector<8x32xf32>
    %139 = arith.mulf %135, %134 : vector<8x32xf32>
    %140 = arith.addf %138, %139 : vector<8x32xf32>
    %141 = math.tanh %140 : vector<8x32xf32>
    %142 = arith.mulf %137, %141 : vector<8x32xf32>
    %143 = vector.extract_strided_slice %142 {offsets = [0, 0], sizes = [8, 16], strides = [1, 1]} : vector<8x32xf32> to vector<8x16xf32>
    %c40_36 = arith.constant 40 : index
    %c0_37 = arith.constant 0 : index
    %144 = vector.load %arg9[%c40_36, %c0_37] : memref<64x32xf32, #tpu.memory_space<vmem>>, vector<8x16xf32>
    tpu.vector_store %arg9[%c40_36, %c0_37], %143 {strides = array<i32>} : memref<64x32xf32, #tpu.memory_space<vmem>>, vector<8x16xf32>,
    %145 = vector.extract_strided_slice %142 {offsets = [0, 16], sizes = [8, 16], strides = [1, 1]} : vector<8x32xf32> to vector<8x16xf32>
    %c16_38 = arith.constant 16 : index
    %c16_39 = arith.constant 16 : index
    %146 = vector.load %arg9[%c16_38, %c16_39] : memref<64x32xf32, #tpu.memory_space<vmem>>, vector<8x16xf32>
    tpu.vector_store %arg9[%c16_38, %c16_39], %145 {strides = array<i32>} : memref<64x32xf32, #tpu.memory_space<vmem>>, vector<8x16xf32>,
    %147 = vector.extract_strided_slice %5 {offsets = [48, 0], sizes = [8, 128], strides = [1, 1]} : vector<64x128xf32> to vector<8x128xf32>
    %cst_40 = arith.constant dense<0.000000e+00> : vector<8x128xf32>
    %148 = tpu.matmul %142, %6, %cst_40 {dimension_numbers = #tpu.dot_dimension_numbers<[1], [0], [0], [1], [0, 0, 1, 1], [], []>} : vector<8x32xf32>, vector<32x128xf32>, vector<8x128xf32> -> vector<8x128xf32>
    %149 = arith.addf %147, %148 : vector<8x128xf32>
    %150 = vector.extract_strided_slice %149 {offsets = [0, 0], sizes = [8, 96], strides = [1, 1]} : vector<8x128xf32> to vector<8x96xf32>
    %151 = arith.negf %150 : vector<8x96xf32>
    %152 = math.exp %151 : vector<8x96xf32>
    %cst_41 = arith.constant 1.000000e+00 : f32
    %153 = vector.broadcast %cst_41 : f32 to vector<8x96xf32>
    %154 = arith.addf %153, %152 : vector<8x96xf32>
    %155 = arith.divf %153, %154 : vector<8x96xf32>
    %156 = vector.extract_strided_slice %149 {offsets = [0, 96], sizes = [8, 32], strides = [1, 1]} : vector<8x128xf32> to vector<8x32xf32>
    %157 = math.tanh %156 : vector<8x32xf32>
    %158 = vector.extract_strided_slice %155 {offsets = [0, 0], sizes = [8, 32], strides = [1, 1]} : vector<8x96xf32> to vector<8x32xf32>
    %159 = vector.extract_strided_slice %155 {offsets = [0, 32], sizes = [8, 32], strides = [1, 1]} : vector<8x96xf32> to vector<8x32xf32>
    %160 = vector.extract_strided_slice %155 {offsets = [0, 64], sizes = [8, 32], strides = [1, 1]} : vector<8x96xf32> to vector<8x32xf32>
    %161 = arith.mulf %159, %140 : vector<8x32xf32>
    %162 = arith.mulf %158, %157 : vector<8x32xf32>
    %163 = arith.addf %161, %162 : vector<8x32xf32>
    %164 = math.tanh %163 : vector<8x32xf32>
    %165 = arith.mulf %160, %164 : vector<8x32xf32>
    %166 = vector.extract_strided_slice %165 {offsets = [0, 0], sizes = [8, 16], strides = [1, 1]} : vector<8x32xf32> to vector<8x16xf32>
    %c48_42 = arith.constant 48 : index
    %c0_43 = arith.constant 0 : index
    %167 = vector.load %arg9[%c48_42, %c0_43] : memref<64x32xf32, #tpu.memory_space<vmem>>, vector<8x16xf32>
    tpu.vector_store %arg9[%c48_42, %c0_43], %166 {strides = array<i32>} : memref<64x32xf32, #tpu.memory_space<vmem>>, vector<8x16xf32>,
    %168 = vector.extract_strided_slice %165 {offsets = [0, 16], sizes = [8, 16], strides = [1, 1]} : vector<8x32xf32> to vector<8x16xf32>
    %c8_44 = arith.constant 8 : index
    %c16_45 = arith.constant 16 : index
    %169 = vector.load %arg9[%c8_44, %c16_45] : memref<64x32xf32, #tpu.memory_space<vmem>>, vector<8x16xf32>
    tpu.vector_store %arg9[%c8_44, %c16_45], %168 {strides = array<i32>} : memref<64x32xf32, #tpu.memory_space<vmem>>, vector<8x16xf32>,
    %170 = vector.extract_strided_slice %5 {offsets = [56, 0], sizes = [8, 128], strides = [1, 1]} : vector<64x128xf32> to vector<8x128xf32>
    %cst_46 = arith.constant dense<0.000000e+00> : vector<8x128xf32>
    %171 = tpu.matmul %165, %6, %cst_46 {dimension_numbers = #tpu.dot_dimension_numbers<[1], [0], [0], [1], [0, 0, 1, 1], [], []>} : vector<8x32xf32>, vector<32x128xf32>, vector<8x128xf32> -> vector<8x128xf32>
    %172 = arith.addf %170, %171 : vector<8x128xf32>
    %173 = vector.extract_strided_slice %172 {offsets = [0, 0], sizes = [8, 96], strides = [1, 1]} : vector<8x128xf32> to vector<8x96xf32>
    %174 = arith.negf %173 : vector<8x96xf32>
    %175 = math.exp %174 : vector<8x96xf32>
    %cst_47 = arith.constant 1.000000e+00 : f32
    %176 = vector.broadcast %cst_47 : f32 to vector<8x96xf32>
    %177 = arith.addf %176, %175 : vector<8x96xf32>
    %178 = arith.divf %176, %177 : vector<8x96xf32>
    %179 = vector.extract_strided_slice %172 {offsets = [0, 96], sizes = [8, 32], strides = [1, 1]} : vector<8x128xf32> to vector<8x32xf32>
    %180 = math.tanh %179 : vector<8x32xf32>
    %181 = vector.extract_strided_slice %178 {offsets = [0, 0], sizes = [8, 32], strides = [1, 1]} : vector<8x96xf32> to vector<8x32xf32>
    %182 = vector.extract_strided_slice %178 {offsets = [0, 32], sizes = [8, 32], strides = [1, 1]} : vector<8x96xf32> to vector<8x32xf32>
    %183 = vector.extract_strided_slice %178 {offsets = [0, 64], sizes = [8, 32], strides = [1, 1]} : vector<8x96xf32> to vector<8x32xf32>
    %184 = arith.mulf %182, %163 : vector<8x32xf32>
    %185 = arith.mulf %181, %180 : vector<8x32xf32>
    %186 = arith.addf %184, %185 : vector<8x32xf32>
    %187 = math.tanh %186 : vector<8x32xf32>
    %188 = arith.mulf %183, %187 : vector<8x32xf32>
    %189 = vector.extract_strided_slice %188 {offsets = [0, 0], sizes = [8, 16], strides = [1, 1]} : vector<8x32xf32> to vector<8x16xf32>
    %c56_48 = arith.constant 56 : index
    %c0_49 = arith.constant 0 : index
    %190 = vector.load %arg9[%c56_48, %c0_49] : memref<64x32xf32, #tpu.memory_space<vmem>>, vector<8x16xf32>
    tpu.vector_store %arg9[%c56_48, %c0_49], %189 {strides = array<i32>} : memref<64x32xf32, #tpu.memory_space<vmem>>, vector<8x16xf32>,
    %191 = vector.extract_strided_slice %188 {offsets = [0, 16], sizes = [8, 16], strides = [1, 1]} : vector<8x32xf32> to vector<8x16xf32>
    %c0_50 = arith.constant 0 : index
    %c16_51 = arith.constant 16 : index
    %192 = vector.load %arg9[%c0_50, %c16_51] : memref<64x32xf32, #tpu.memory_space<vmem>>, vector<8x16xf32>
    tpu.vector_store %arg9[%c0_50, %c16_51], %191 {strides = array<i32>} : memref<64x32xf32, #tpu.memory_space<vmem>>, vector<8x16xf32>,
    %c0_52 = arith.constant 0 : index
    %c0_53 = arith.constant 0 : index
    %193 = vector.load %arg9[%c0_52, %c0_53] : memref<64x32xf32, #tpu.memory_space<vmem>>, vector<64x32xf32>
    %c0_54 = arith.constant 0 : index
    %c0_55 = arith.constant 0 : index
    %194 = vector.load %arg6[%c0_54, %c0_55] : memref<32x128xf32, #tpu.memory_space<vmem>>, vector<32x128xf32>
    %cst_56 = arith.constant dense<0.000000e+00> : vector<64x128xf32>
    %195 = tpu.matmul %193, %194, %cst_56 {dimension_numbers = #tpu.dot_dimension_numbers<[1], [0], [0], [1], [0, 0, 1, 1], [], []>} : vector<64x32xf32>, vector<32x128xf32>, vector<64x128xf32> -> vector<64x128xf32>
    %c0_57 = arith.constant 0 : index
    %c0_58 = arith.constant 0 : index
    %196 = vector.load %arg7[%c0_57, %c0_58] : memref<1x128xf32, #tpu.memory_space<vmem>>, vector<1x128xf32>
    %197 = vector.broadcast %196 : vector<1x128xf32> to vector<64x128xf32>
    %198 = arith.addf %195, %197 : vector<64x128xf32>
    %c0_59 = arith.constant 0 : index
    %c0_60 = arith.constant 0 : index
    %199 = vector.load %arg8[%c0_59, %c0_60] : memref<64x128xf32, #tpu.memory_space<vmem>>, vector<64x128xf32>
    tpu.vector_store %arg8[%c0_59, %c0_60], %198 {strides = array<i32>} : memref<64x128xf32, #tpu.memory_space<vmem>>, vector<64x128xf32>,
    return
  }
}

</mosaic_0001>

<bundles_post_ra>
// kernel: tpu_custom_call.1
= control target key start
LH: loop header
LB: loop body
LE: loop exit
PB: predicated region body
PF: predicated region fallthrough
CT: control target
= control target key end

     0   :  { %13 = vsyncpa [#allocation4], 0  ;;  %s1247_s0 = inlined_call_operand.vmem [shape: f32[64,32], index: 0, kind: input, shape index: {}]   ;;  %s1248_s1 = inlined_call_operand.hbm [shape: f32[8,32], index: 1, kind: input, shape index: {}]   ;;  %s1249_s2 = inlined_call_operand.hbm [shape: f32[8,32], index: 2, kind: input, shape index: {}]   ;;  %s1250_s3 = inlined_call_operand.vmem [shape: f32[32,128], index: 3, kind: input, shape index: {}]   ;;  %s1251_s4 = inlined_call_operand.vmem [shape: f32[32,128], index: 4, kind: input, shape index: {}]   ;;  %s1252_s5 = inlined_call_operand.vmem [shape: f32[1,128], index: 5, kind: input, shape index: {}]   ;;  %s1253_s6 = inlined_call_operand.vmem [shape: f32[32,128], index: 6, kind: input, shape index: {}]   ;;  %s1254_s7 = inlined_call_operand.vmem [shape: f32[1,128], index: 7, kind: input, shape index: {}]   ;;  %s1255_s8 = inlined_call_operand.hbm [shape: f32[64,128], index: 8, kind: output, shape index: {}]  }
   0x1   :  { %14 = vsyncpa [#allocation7], 0 }
   0x2   :  { %15 = vsyncpa [#allocation5], 0  ;;  %s23_s29 = sshll.u32 %s1248_s1, 4  ;;  %s981_s30 = smov [#allocation3]   ;;  %s24_s29 = int_to_ptr.hbm [resolvable:$true] %s23_s29 }
   0x3   :  { %s25_s9 = sshll.u32 %s981_s30, 4  ;;  %s34_s12 = sshll.u32 %s1249_s2, 4  ;;  %s26_s9 = int_to_ptr.vmem [resolvable:$true] %s25_s9  ;;  %s35_s12 = int_to_ptr.hbm [resolvable:$true] %s34_s12 }
   0x4   :  { %28 = dma.hbm_to_vmem [thread:$0]  %s24_s29, 128, %s26_s9, [#allocation4]  }
   0x5   :  { %s982_s13 = smov [#allocation6]  }
   0x6   :  { %s36_s14 = sshll.u32 %s982_s13, 4  ;;  %s37_s14 = int_to_ptr.vmem [resolvable:$true] %s36_s14 }
   0x7   :  { %39 = dma.hbm_to_vmem [thread:$0]  %s35_s12, 128, %s37_s14, [#allocation7]  }
   0x8   :  { %975 = dma.done.wait [#allocation4], 128  }
   0x9   :  { %976 = vsyncadd [#allocation4], 4294967168 }
   0xa   :  { %977 = dma.done.wait [#allocation7], 128  }
   0xb   :  { %978 = vsyncadd [#allocation7], 4294967168  ;;  %v69_v0 = vld [vmem:[%s1250_s3 + $0x18] sm:$0xff]  ;;  %v68_v1 = vld [vmem:[%s1250_s3 + $0x10] sm:$0xff]  ;;  %vm74_vm0 = vcmask 261120   ;;  %s983_s13 = smov 32  }
   0xc   :  { %822 = vmatpush.msra.mxu2 %v69_v0  ;;  %v1048_v2 = vld [vmem:[%s1251_s4 + $0x18] sm:$0xff]  ;;  %111 = vmatpush.msra.mxu0 %v69_v0  ;;  %v67_v3 = vld [vmem:[%s1250_s3 + $0x8] sm:$0xff]  ;;  %v1058_v4 = vld [vmem:[%s1251_s4 + $0x10] sm:$0xff]  ;;  %vm215_vm5 = vcmask 130048   ;;  %vm217_vm6 = vcmask 261248   ;;  %s776_s10 = sshll.u32 %s1255_s8, 4  ;;  %s777_s10 = int_to_ptr.hbm [resolvable:$true] %s776_s10 }
   0xd   :  { %299 = vmatpush.msra.mxu3 %v1048_v2  ;;  %365 = vmatpush.msra.mxu1 %v1048_v2  ;;  %v66_v5 = vld [vmem:[%s1250_s3] sm:$0xff]  ;;  %v64_v6 = vld [vmem:[%s1247_s0 + $0x30] sm:$0xff]  ;;  %v1071_v7 = vld [vmem:[%s1251_s4 + $0x8] sm:$0xff]  ;;  %s986_s11 = smov 128  }
   0xe   :  { %823 = vmatpush.msra.mxu2 %v68_v1  ;;  %112 = vmatpush.msra.mxu0 %v68_v1  ;;  %v58_v8 = vld [vmem:[%s1247_s0] sm:$0xff]  ;;  %v65_v10 = vld [vmem:[%s1247_s0 + $0x38] sm:$0xff]  ;;  %v145_v20 = vld [vmem:[#allocation6] sm:$0xff] }
   0xf   :  { %300 = vmatpush.msra.mxu3 %v1058_v4  ;;  %366 = vmatpush.msra.mxu1 %v1058_v4  ;;  %v1082_v9 = vld [vmem:[%s1251_s4] sm:$0xff]  ;;  %v59_v43 = vld [vmem:[%s1247_s0 + $0x8] sm:$0xff]  ;;  %s987_s4 = smov 8  }
  0x10   :  { %824 = vmatpush.msra.mxu2 %v67_v3  ;;  %113 = vmatpush.msra.mxu0 %v67_v3  ;;  %v144_v11 = vld [vmem:[#allocation3] sm:$0xff] }
  0x11   :  { %301 = vmatpush.msra.mxu3 %v1071_v7  ;;  %367 = vmatpush.msra.mxu1 %v1071_v7  ;;  %v1119_v15 = vld [vmem:[%s1252_s5] ss:$0 sm:$0xff]  ;;  %s984_s5 = smov 64  }
  0x12   :  { %825 = vmatpush.msra.mxu2 %v66_v5  ;;  %114 = vmatpush.msra.mxu0 %v66_v5 }
  0x13   :  { %796 = vmatmul.msk.f32.vlgmr.msra.gmra.mxu2 %vm74_vm0, %v64_v6  ;;  %790 = vmatmul.msk.f32.vlgmr.msra.gmra.mxu0 %vm74_vm0, %v58_v8 }
  0x14   :  { %161 = vmatpush.msrb.mxu2 %v1048_v2  ;;  %302 = vmatpush.msra.mxu3 %v1082_v9 }
  0x15   :  { %368 = vmatpush.msra.mxu1 %v1082_v9 }
  0x16   :  { %497 = vmatpush.msrb.mxu3 %v1048_v2  ;;  %162 = vmatpush.msrb.mxu2 %v1058_v4 }
  0x17   :  { %563 = vmatpush.msrb.mxu1 %v1048_v2 }
  0x18   :  { %498 = vmatpush.msrb.mxu3 %v1058_v4  ;;  %163 = vmatpush.msrb.mxu2 %v1071_v7 }
  0x19   :  { %564 = vmatpush.msrb.mxu1 %v1058_v4 }
  0x1a   :  { %499 = vmatpush.msrb.mxu3 %v1071_v7  ;;  %164 = vmatpush.msrb.mxu2 %v1082_v9 }
  0x1b   :  { %565 = vmatpush.msrb.mxu1 %v1071_v7  ;;  %797 = vmatmul.msk.f32.gmra.mxu2 %vm74_vm0, %v65_v10 }
  0x1c   :  { %500 = vmatpush.msrb.mxu3 %v1082_v9  ;;  %233 = vmatpush.msra.mxu2 %v1048_v2 }
  0x1d   :  { %566 = vmatpush.msrb.mxu1 %v1082_v9  ;;  %791 = vmatmul.msk.f32.gmra.mxu0 %vm74_vm0, %v59_v43 }
  0x1e   :  { %234 = vmatpush.msra.mxu2 %v1058_v4 }
  0x20   :  { %235 = vmatpush.msra.mxu2 %v1071_v7 }
  0x22   :  { %236 = vmatpush.msra.mxu2 %v1082_v9 }
  0x23   :  { %798 = vmatmul.msk.f32.vlgmr.msrb.gmra.mxu2 %vm74_vm0, %v144_v11 }
  0x24   :  { %431 = vmatpush.msrb.mxu2 %v1048_v2 }
  0x26   :  { %432 = vmatpush.msrb.mxu2 %v1058_v4 }
  0x28   :  { %433 = vmatpush.msrb.mxu2 %v1071_v7 }
  0x2a   :  { %434 = vmatpush.msrb.mxu2 %v1082_v9 }
  0x90   :  { %v116_v14 = vpop.f32.mrf.mxu0 }
  0x91   :  { %v117_v16 = vadd.f32 %v1119_v15, %v116_v14 }
  0x96   :  { %v1112_v12 = vpop.f32.mrf.mxu2 }
  0x9a   :  { %v119_v45 = vpop.f32.mrf.mxu0 }
  0x9b   :  { %v120_v46 = vadd.f32 %v1119_v15, %v119_v45 }
  0x9e   :  { %v1114_v13 = vpop.f32.mrf.mxu2 }
  0xa6   :  { %v166_v17 = vpop.f32.mrf.mxu2 }
  0xa7   :  { %v169_v18 = vadd.f32 %v166_v17, %v117_v16 }
  0xa9   :  { %839 = vtanh.f32 %v169_v18  ;;  %v799_v21 = vmul.f32 -1.442695, %v169_v18 }
  0xab   :  { %841 = vpow2.f32 %v799_v21 }
  0xaf   :  { %v840_v19 = vpop.eup %839 }
  0xb0   :  { %196 = vrot.lane.b32.xlu0 %v840_v19, %s983_s13 }
  0xb1   :  { %v842_v22 = vpop.eup %841 }
  0xb2   :  { %v173_v23 = vadd.f32 1.0, %v842_v22 }
  0xb4   :  { %843 = vrcp.f32 %v173_v23  ;;  %v185_v29 = vand.u32 2147483648, %v173_v23  ;;  %vm179_vm2 = vweird.f32 %v173_v23  ;;  %v183_v30 = vand.u32 2147483647, %v173_v23 }
  0xb6   :  { %v186_v32 = vor.u32 1.1754944e-38, %v185_v29  ;;  %vm184_vm4 = vcmp.eq.f32.partialorder %v183_v30, 8.507059e+37 }
  0xb8   :  { %191 = vrot.lane.b32.xlu0 %v145_v20, %s983_s13 }
  0xba   :  { %v844_v24 = vpop.eup %843 }
  0xbb   :  { %v175_v25 = vmul.f32 %v844_v24, %v173_v23  ;;  %vm180_vm1 = vweird.f32 %v844_v24 }
  0xbc   :  { %vm181_vm3 = vmor %vm179_vm2, %vm180_vm1 }
  0xbd   :  { %v176_v26 = vsub.f32 1.0, %v175_v25 }
  0xbf   :  { %v177_v27 = vmul.f32 %v844_v24, %v176_v26 }
  0xc1   :  { %v178_v28 = vadd.f32 %v844_v24, %v177_v27 }
  0xc3   :  { %v182_v31 = vsel %vm181_vm3, %v844_v24, %v178_v28 }
  0xc4   :  { %v187_v34 = vsel %vm184_vm4, %v186_v32, %v182_v31 }
 0x122   :  { %v197_v33 = vpop.permute.xlu0 %196 }
 0x123   :  { %v199_v35 = vmul.f32 %v197_v33, %v187_v34 }
 0x125   :  { %201 = vrot.lane.b32.xlu1 %v199_v35, %s983_s13 }
 0x12a   :  { %v192_v36 = vpop.permute.xlu0 %191 }
 0x12b   :  { %v194_v37 = vmul.f32 %v192_v36, %v187_v34  ;;  %v61_v36 = vld [vmem:[%s1247_s0 + $0x18] sm:$0xff] }
 0x197   :  { %v202_v38 = vpop.permute.xlu1 %201 }
 0x198   :  { %v204_v39 = vadd.f32 %v202_v38, %v194_v37 }
 0x19a   :  { %845 = vtanh.f32 %v204_v39 }
 0x1a0   :  { %v846_v40 = vpop.eup %845 }
 0x1a1   :  { %207 = vrot.lane.b32.xlu1 %v846_v40, %s983_s13 }
 0x213   :  { %v208_v41 = vpop.permute.xlu1 %207 }
 0x214   :  { %v210_v42 = vmul.f32 %v208_v41, %v187_v34 }
 0x216   :  { %212 = vrot.lane.b32.xlu2 %v210_v42, %s984_s5 }
 0x270   :  { %v213_v44 = vpop.permute.xlu2 %212 }
 0x271   :  { %216 = vst.msk [vmem:[#allocation2] sm:$0xff] %vm215_vm5, %v213_v44  ;;  %800 = vmatmul.msk.f32.vlgmr.msra.gmra.mxu2 %vm74_vm0, %v213_v44 }
 0x272   :  { %218 = vst.msk [vmem:[#allocation2 + $0x38] sm:$0xff] %vm217_vm6, %v213_v44  ;;  %629 = vmatpush.msra.mxu2 %v1048_v2 }
 0x274   :  { %630 = vmatpush.msra.mxu2 %v1058_v4 }
 0x276   :  { %631 = vmatpush.msra.mxu2 %v1071_v7  ;;  %v60_v7 = vld [vmem:[%s1247_s0 + $0x10] sm:$0xff] }
 0x277   :  { %792 = vmatmul.msk.f32.gmra.mxu0 %vm74_vm0, %v60_v7 }
 0x278   :  { %632 = vmatpush.msra.mxu2 %v1082_v9 }
 0x27f   :  { %793 = vmatmul.msk.f32.gmra.mxu0 %vm74_vm0, %v61_v36  ;;  %v690_v36 = vld [vmem:[%s1253_s6 + $0x8] sm:$0xff] }
 0x2f4   :  { %v238_v47 = vpop.f32.mrf.mxu2  ;;  %v122_v9 = vpop.f32.mrf.mxu0 }
 0x2f5   :  { %v241_v48 = vadd.f32 %v238_v47, %v120_v46  ;;  %v123_v10 = vadd.f32 %v1119_v15, %v122_v9 }
 0x2f7   :  { %847 = vtanh.f32 %v241_v48  ;;  %v801_v50 = vmul.f32 -1.442695, %v241_v48 }
 0x2f9   :  { %849 = vpow2.f32 %v801_v50 }
 0x2fc   :  { %v125_v40 = vpop.f32.mrf.mxu0 }
 0x2fd   :  { %v848_v49 = vpop.eup %847  ;;  %v126_v41 = vadd.f32 %v1119_v15, %v125_v40 }
 0x2fe   :  { %264 = vrot.lane.b32.xlu2 %v848_v49, %s983_s13 }
 0x2ff   :  { %v850_v51 = vpop.eup %849 }
 0x300   :  { %v245_v52 = vadd.f32 1.0, %v850_v51 }
 0x302   :  { %851 = vrcp.f32 %v245_v52  ;;  %v257_v58 = vand.u32 2147483648, %v245_v52  ;;  %vm251_vm8 = vweird.f32 %v245_v52  ;;  %v255_v59 = vand.u32 2147483647, %v245_v52 }
 0x304   :  { %v258_v61 = vor.u32 1.1754944e-38, %v257_v58  ;;  %vm256_vm10 = vcmp.eq.f32.partialorder %v255_v59, 8.507059e+37 }
 0x308   :  { %v852_v53 = vpop.eup %851 }
 0x309   :  { %v247_v54 = vmul.f32 %v852_v53, %v245_v52  ;;  %vm252_vm7 = vweird.f32 %v852_v53 }
 0x30a   :  { %vm253_vm9 = vmor %vm251_vm8, %vm252_vm7 }
 0x30b   :  { %v248_v55 = vsub.f32 1.0, %v247_v54 }
 0x30d   :  { %v249_v56 = vmul.f32 %v852_v53, %v248_v55 }
 0x30f   :  { %v250_v57 = vadd.f32 %v852_v53, %v249_v56 }
 0x311   :  { %v254_v60 = vsel %vm253_vm9, %v852_v53, %v250_v57 }
 0x312   :  { %v259_v63 = vsel %vm256_vm10, %v258_v61, %v254_v60 }
 0x313   :  { %v262_v1 = vmul.f32 %v259_v63, %v204_v39 }
 0x358   :  { %v265_v62 = vpop.permute.xlu2 %264 }
 0x359   :  { %v267_v0 = vmul.f32 %v265_v62, %v259_v63 }
 0x35b   :  { %269 = vrot.lane.b32.xlu0 %v267_v0, %s983_s13 }
 0x3cd   :  { %v270_v2 = vpop.permute.xlu0 %269 }
 0x3ce   :  { %v272_v3 = vadd.f32 %v270_v2, %v262_v1  ;;  %v62_v2 = vld [vmem:[%s1247_s0 + $0x20] sm:$0xff] }
 0x3cf   :  { %794 = vmatmul.msk.f32.gmra.mxu0 %vm74_vm0, %v62_v2 }
 0x3d0   :  { %853 = vtanh.f32 %v272_v3 }
 0x3d6   :  { %v854_v4 = vpop.eup %853 }
 0x3d7   :  { %275 = vrot.lane.b32.xlu1 %v854_v4, %s983_s13 }
 0x449   :  { %v276_v5 = vpop.permute.xlu1 %275 }
 0x44a   :  { %v278_v6 = vmul.f32 %v276_v5, %v259_v63 }
 0x44c   :  { %280 = vrot.lane.b32.xlu2 %v278_v6, %s984_s5  ;;  %v128_v4 = vpop.f32.mrf.mxu0 }
 0x44d   :  { %v129_v5 = vadd.f32 %v1119_v15, %v128_v4 }
 0x4a6   :  { %v281_v8 = vpop.permute.xlu2 %280 }
 0x4a7   :  { %283 = vst.msk [vmem:[#allocation2 + $0x8] sm:$0xff] %vm215_vm5, %v281_v8  ;;  %802 = vmatmul.msk.f32.vlgmr.msra.gmra.mxu3 %vm74_vm0, %v281_v8 }
 0x4a8   :  { %284 = vst.msk [vmem:[#allocation2 + $0x30] sm:$0xff] %vm217_vm6, %v281_v8 }
 0x52a   :  { %v304_v11 = vpop.f32.mrf.mxu3 }
 0x52b   :  { %v307_v14 = vadd.f32 %v304_v11, %v123_v10 }
 0x52d   :  { %855 = vtanh.f32 %v307_v14  ;;  %v803_v17 = vmul.f32 -1.442695, %v307_v14 }
 0x52f   :  { %857 = vpow2.f32 %v803_v17 }
 0x533   :  { %v856_v16 = vpop.eup %855 }
 0x534   :  { %330 = vrot.lane.b32.xlu0 %v856_v16, %s983_s13 }
 0x535   :  { %v858_v18 = vpop.eup %857 }
 0x536   :  { %v311_v19 = vadd.f32 1.0, %v858_v18 }
 0x538   :  { %859 = vrcp.f32 %v311_v19  ;;  %v323_v25 = vand.u32 2147483648, %v311_v19  ;;  %vm317_vm12 = vweird.f32 %v311_v19  ;;  %v321_v26 = vand.u32 2147483647, %v311_v19 }
 0x53a   :  { %v324_v28 = vor.u32 1.1754944e-38, %v323_v25  ;;  %vm322_vm14 = vcmp.eq.f32.partialorder %v321_v26, 8.507059e+37 }
 0x53e   :  { %v860_v20 = vpop.eup %859 }
 0x53f   :  { %v313_v21 = vmul.f32 %v860_v20, %v311_v19  ;;  %vm318_vm11 = vweird.f32 %v860_v20 }
 0x540   :  { %vm319_vm13 = vmor %vm317_vm12, %vm318_vm11 }
 0x541   :  { %v314_v22 = vsub.f32 1.0, %v313_v21 }
 0x543   :  { %v315_v23 = vmul.f32 %v860_v20, %v314_v22 }
 0x545   :  { %v316_v24 = vadd.f32 %v860_v20, %v315_v23 }
 0x547   :  { %v320_v27 = vsel %vm319_vm13, %v860_v20, %v316_v24 }
 0x548   :  { %v325_v30 = vsel %vm322_vm14, %v324_v28, %v320_v27 }
 0x549   :  { %v328_v32 = vmul.f32 %v325_v30, %v272_v3 }
 0x5a6   :  { %v331_v29 = vpop.permute.xlu0 %330 }
 0x5a7   :  { %v333_v31 = vmul.f32 %v331_v29, %v325_v30 }
 0x5a9   :  { %335 = vrot.lane.b32.xlu1 %v333_v31, %s983_s13 }
 0x61b   :  { %v336_v33 = vpop.permute.xlu1 %335 }
 0x61c   :  { %v338_v34 = vadd.f32 %v336_v33, %v328_v32  ;;  %v692_v33 = vld [vmem:[%s1253_s6 + $0x18] sm:$0xff] }
 0x61d   :  { %826 = vmatpush.msra.mxu3 %v692_v33 }
 0x61e   :  { %861 = vtanh.f32 %v338_v34 }
 0x624   :  { %v862_v35 = vpop.eup %861 }
 0x625   :  { %341 = vrot.lane.b32.xlu2 %v862_v35, %s983_s13  ;;  %v63_v35 = vld [vmem:[%s1247_s0 + $0x28] sm:$0xff] }
 0x626   :  { %795 = vmatmul.msk.f32.gmra.mxu0 %vm74_vm0, %v63_v35 }
 0x67f   :  { %v342_v37 = vpop.permute.xlu2 %341 }
 0x680   :  { %v344_v38 = vmul.f32 %v342_v37, %v325_v30  ;;  %v689_v37 = vld [vmem:[%s1253_s6] sm:$0xff] }
 0x682   :  { %346 = vrot.lane.b32.xlu0 %v344_v38, %s984_s5 }
 0x6a3   :  { %v131_v40 = vpop.f32.mrf.mxu0 }
 0x6f4   :  { %v347_v39 = vpop.permute.xlu0 %346 }
 0x6f5   :  { %349 = vst.msk [vmem:[#allocation2 + $0x10] sm:$0xff] %vm215_vm5, %v347_v39  ;;  %804 = vmatmul.msk.f32.vlgmr.msra.gmra.mxu1 %vm74_vm0, %v347_v39 }
 0x6f6   :  { %350 = vst.msk [vmem:[#allocation2 + $0x28] sm:$0xff] %vm217_vm6, %v347_v39  ;;  %733 = vmatpush.msra.mxu1 %v692_v33 }
 0x772   :  { %v370_v42 = vpop.f32.mrf.mxu1 }
 0x773   :  { %v373_v43 = vadd.f32 %v370_v42, %v126_v41  ;;  %v132_v41 = vadd.f32 %v1119_v15, %v131_v40 }
 0x775   :  { %863 = vtanh.f32 %v373_v43  ;;  %v805_v45 = vmul.f32 -1.442695, %v373_v43 }
 0x777   :  { %865 = vpow2.f32 %v805_v45 }
 0x77b   :  { %v864_v44 = vpop.eup %863 }
 0x77c   :  { %396 = vrot.lane.b32.xlu1 %v864_v44, %s983_s13  ;;  %v1203_v44 = vld [vmem:[%s1254_s7] ss:$0 sm:$0xff]  ;;  %s985_s7 = smov [#allocation8]  }
 0x77d   :  { %v866_v46 = vpop.eup %865  ;;  %s774_s30 = sshll.u32 %s985_s7, 4  ;;  %s775_s30 = int_to_ptr.vmem [resolvable:$true] %s774_s30 }
 0x77e   :  { %v377_v47 = vadd.f32 1.0, %v866_v46 }
 0x780   :  { %867 = vrcp.f32 %v377_v47  ;;  %v389_v53 = vand.u32 2147483648, %v377_v47  ;;  %vm383_vm1 = vweird.f32 %v377_v47  ;;  %v387_v54 = vand.u32 2147483647, %v377_v47 }
 0x782   :  { %v390_v56 = vor.u32 1.1754944e-38, %v389_v53  ;;  %vm388_vm3 = vcmp.eq.f32.partialorder %v387_v54, 8.507059e+37 }
 0x786   :  { %v868_v48 = vpop.eup %867 }
 0x787   :  { %v379_v49 = vmul.f32 %v868_v48, %v377_v47  ;;  %vm384_vm15 = vweird.f32 %v868_v48 }
 0x788   :  { %vm385_vm2 = vmor %vm383_vm1, %vm384_vm15 }
 0x789   :  { %v380_v50 = vsub.f32 1.0, %v379_v49 }
 0x78b   :  { %v381_v51 = vmul.f32 %v868_v48, %v380_v50 }
 0x78d   :  { %v382_v52 = vadd.f32 %v868_v48, %v381_v51 }
 0x78f   :  { %v386_v55 = vsel %vm385_vm2, %v868_v48, %v382_v52 }
 0x790   :  { %v391_v58 = vsel %vm388_vm3, %v390_v56, %v386_v55 }
 0x791   :  { %v394_v60 = vmul.f32 %v391_v58, %v338_v34  ;;  %v691_v34 = vld [vmem:[%s1253_s6 + $0x10] sm:$0xff] }
 0x792   :  { %827 = vmatpush.msra.mxu3 %v691_v34  ;;  %734 = vmatpush.msra.mxu1 %v691_v34 }
 0x794   :  { %828 = vmatpush.msra.mxu3 %v690_v36  ;;  %735 = vmatpush.msra.mxu1 %v690_v36 }
 0x796   :  { %829 = vmatpush.msra.mxu3 %v689_v37  ;;  %736 = vmatpush.msra.mxu1 %v689_v37 }
 0x7ee   :  { %v397_v57 = vpop.permute.xlu1 %396 }
 0x7ef   :  { %v399_v59 = vmul.f32 %v397_v57, %v391_v58 }
 0x7f1   :  { %401 = vrot.lane.b32.xlu2 %v399_v59, %s983_s13 }
 0x84b   :  { %v402_v61 = vpop.permute.xlu2 %401 }
 0x84c   :  { %v404_v62 = vadd.f32 %v402_v61, %v394_v60 }
 0x84e   :  { %869 = vtanh.f32 %v404_v62 }
 0x854   :  { %v870_v63 = vpop.eup %869 }
 0x855   :  { %407 = vrot.lane.b32.xlu0 %v870_v63, %s983_s13 }
 0x8c7   :  { %v408_v0 = vpop.permute.xlu0 %407 }
 0x8c8   :  { %v410_v1 = vmul.f32 %v408_v0, %v391_v58 }
 0x8ca   :  { %412 = vrot.lane.b32.xlu1 %v410_v1, %s984_s5 }
 0x93c   :  { %v413_v3 = vpop.permute.xlu1 %412 }
 0x93d   :  { %415 = vst.msk [vmem:[#allocation2 + $0x18] sm:$0xff] %vm215_vm5, %v413_v3  ;;  %806 = vmatmul.msk.f32.vlgmr.msrb.gmra.mxu2 %vm74_vm0, %v413_v3 }
 0x93e   :  { %416 = vst.msk [vmem:[#allocation2 + $0x20] sm:$0xff] %vm217_vm6, %v413_v3 }
 0x9c0   :  { %v436_v6 = vpop.f32.mrf.mxu2 }
 0x9c1   :  { %v439_v7 = vadd.f32 %v436_v6, %v129_v5 }
 0x9c3   :  { %871 = vtanh.f32 %v439_v7  ;;  %v807_v9 = vmul.f32 -1.442695, %v439_v7  ;;  %v135_v7 = vadd.f32 %v1119_v15, %v1112_v12 }
 0x9c5   :  { %873 = vpow2.f32 %v807_v9 }
 0x9c9   :  { %v872_v8 = vpop.eup %871 }
 0x9ca   :  { %462 = vrot.lane.b32.xlu2 %v872_v8, %s983_s13 }
 0x9cb   :  { %v874_v10 = vpop.eup %873 }
 0x9cc   :  { %v443_v11 = vadd.f32 1.0, %v874_v10 }
 0x9ce   :  { %875 = vrcp.f32 %v443_v11  ;;  %v455_v20 = vand.u32 2147483648, %v443_v11  ;;  %vm449_vm7 = vweird.f32 %v443_v11  ;;  %v453_v21 = vand.u32 2147483647, %v443_v11 }
 0x9d0   :  { %v456_v23 = vor.u32 1.1754944e-38, %v455_v20  ;;  %vm454_vm9 = vcmp.eq.f32.partialorder %v453_v21, 8.507059e+37 }
 0x9d4   :  { %v876_v14 = vpop.eup %875 }
 0x9d5   :  { %v445_v16 = vmul.f32 %v876_v14, %v443_v11  ;;  %vm450_vm4 = vweird.f32 %v876_v14 }
 0x9d6   :  { %vm451_vm8 = vmor %vm449_vm7, %vm450_vm4 }
 0x9d7   :  { %v446_v17 = vsub.f32 1.0, %v445_v16 }
 0x9d9   :  { %v447_v18 = vmul.f32 %v876_v14, %v446_v17 }
 0x9db   :  { %v448_v19 = vadd.f32 %v876_v14, %v447_v18 }
 0x9dd   :  { %v452_v22 = vsel %vm451_vm8, %v876_v14, %v448_v19 }
 0x9de   :  { %v457_v25 = vsel %vm454_vm9, %v456_v23, %v452_v22 }
 0x9df   :  { %v460_v27 = vmul.f32 %v457_v25, %v404_v62 }
 0xa24   :  { %v463_v24 = vpop.permute.xlu2 %462 }
 0xa25   :  { %v465_v26 = vmul.f32 %v463_v24, %v457_v25 }
 0xa27   :  { %467 = vrot.lane.b32.xlu0 %v465_v26, %s983_s13 }
 0xa99   :  { %v468_v28 = vpop.permute.xlu0 %467 }
 0xa9a   :  { %v470_v29 = vadd.f32 %v468_v28, %v460_v27 }
 0xa9c   :  { %877 = vtanh.f32 %v470_v29 }
 0xaa2   :  { %v878_v30 = vpop.eup %877 }
 0xaa3   :  { %473 = vrot.lane.b32.xlu1 %v878_v30, %s983_s13 }
 0xb15   :  { %v474_v31 = vpop.permute.xlu1 %473 }
 0xb16   :  { %v476_v32 = vmul.f32 %v474_v31, %v457_v25 }
 0xb18   :  { %478 = vrot.lane.b32.xlu2 %v476_v32, %s984_s5 }
 0xb72   :  { %v479_v38 = vpop.permute.xlu2 %478 }
 0xb73   :  { %481 = vst.msk [vmem:[#allocation2 + $0x20] sm:$0xff] %vm215_vm5, %v479_v38  ;;  %808 = vmatmul.msk.f32.vlgmr.msrb.gmra.mxu3 %vm74_vm0, %v479_v38 }
 0xb74   :  { %482 = vst.msk [vmem:[#allocation2 + $0x18] sm:$0xff] %vm217_vm6, %v479_v38  ;;  %v138_v38 = vadd.f32 %v1119_v15, %v1114_v13 }
 0xb7a   :  { %v685_v39 = vld [vmem:[#allocation2 + $0x20] sm:$0xff] }
 0xb7b   :  { %818 = vmatmul.msk.f32.vlgmr.msra.gmra.mxu3 %vm74_vm0, %v685_v39 }
 0xbf6   :  { %v502_v42 = vpop.f32.mrf.mxu3 }
 0xbf7   :  { %v505_v43 = vadd.f32 %v502_v42, %v132_v41 }
 0xbf9   :  { %879 = vtanh.f32 %v505_v43  ;;  %v809_v48 = vmul.f32 -1.442695, %v505_v43 }
 0xbfb   :  { %881 = vpow2.f32 %v809_v48 }
 0xbfe   :  { %v750_v45 = vpop.f32.mrf.mxu3 }
 0xbff   :  { %v880_v46 = vpop.eup %879  ;;  %v751_v47 = vadd.f32 %v1203_v44, %v750_v45 }
 0xc00   :  { %528 = vrot.lane.b32.xlu0 %v880_v46, %s983_s13 }
 0xc01   :  { %766 = vst [vmem:[#allocation8 + $0x20] sm:$0xff] %v751_v47  ;;  %v882_v49 = vpop.eup %881 }
 0xc02   :  { %v509_v50 = vadd.f32 1.0, %v882_v49 }
 0xc04   :  { %883 = vrcp.f32 %v509_v50  ;;  %v521_v56 = vand.u32 2147483648, %v509_v50  ;;  %vm515_vm11 = vweird.f32 %v509_v50  ;;  %v519_v57 = vand.u32 2147483647, %v509_v50 }
 0xc06   :  { %v522_v59 = vor.u32 1.1754944e-38, %v521_v56  ;;  %vm520_vm13 = vcmp.eq.f32.partialorder %v519_v57, 8.507059e+37 }
 0xc0a   :  { %v884_v51 = vpop.eup %883 }
 0xc0b   :  { %v511_v52 = vmul.f32 %v884_v51, %v509_v50  ;;  %vm516_vm10 = vweird.f32 %v884_v51 }
 0xc0c   :  { %vm517_vm12 = vmor %vm515_vm11, %vm516_vm10 }
 0xc0d   :  { %v512_v53 = vsub.f32 1.0, %v511_v52 }
 0xc0f   :  { %v513_v54 = vmul.f32 %v884_v51, %v512_v53 }
 0xc11   :  { %v514_v55 = vadd.f32 %v884_v51, %v513_v54 }
 0xc13   :  { %v518_v58 = vsel %vm517_vm12, %v884_v51, %v514_v55 }
 0xc14   :  { %v523_v61 = vsel %vm520_vm13, %v522_v59, %v518_v58 }
 0xc15   :  { %v526_v63 = vmul.f32 %v523_v61, %v470_v29 }
 0xc72   :  { %v529_v60 = vpop.permute.xlu0 %528 }
 0xc73   :  { %v531_v62 = vmul.f32 %v529_v60, %v523_v61 }
 0xc75   :  { %533 = vrot.lane.b32.xlu1 %v531_v62, %s983_s13 }
 0xce7   :  { %v534_v0 = vpop.permute.xlu1 %533 }
 0xce8   :  { %v536_v1 = vadd.f32 %v534_v0, %v526_v63 }
 0xcea   :  { %885 = vtanh.f32 %v536_v1 }
 0xcf0   :  { %v886_v2 = vpop.eup %885 }
 0xcf1   :  { %539 = vrot.lane.b32.xlu2 %v886_v2, %s983_s13 }
 0xd4b   :  { %v540_v3 = vpop.permute.xlu2 %539 }
 0xd4c   :  { %v542_v4 = vmul.f32 %v540_v3, %v523_v61 }
 0xd4e   :  { %544 = vrot.lane.b32.xlu0 %v542_v4, %s984_s5 }
 0xdc0   :  { %v545_v5 = vpop.permute.xlu0 %544 }
 0xdc1   :  { %547 = vst.msk [vmem:[#allocation2 + $0x28] sm:$0xff] %vm215_vm5, %v545_v5  ;;  %810 = vmatmul.msk.f32.vlgmr.msrb.gmra.mxu1 %vm74_vm0, %v545_v5 }
 0xdc2   :  { %548 = vst.msk [vmem:[#allocation2 + $0x10] sm:$0xff] %vm217_vm6, %v545_v5  ;;  %v684_v5 = vld [vmem:[#allocation2 + $0x18] sm:$0xff] }
 0xdc8   :  { %v686_v6 = vld [vmem:[#allocation2 + $0x28] sm:$0xff] }
 0xdc9   :  { %819 = vmatmul.msk.f32.gmra.mxu3 %vm74_vm0, %v686_v6  ;;  %v683_v4 = vld [vmem:[#allocation2 + $0x10] sm:$0xff] }
 0xe3e   :  { %v568_v8 = vpop.f32.mrf.mxu1 }
 0xe3f   :  { %v571_v9 = vadd.f32 %v568_v8, %v135_v7 }
 0xe41   :  { %887 = vtanh.f32 %v571_v9  ;;  %v811_v16 = vmul.f32 -1.442695, %v571_v9 }
 0xe43   :  { %889 = vpow2.f32 %v811_v16 }
 0xe47   :  { %v888_v10 = vpop.eup %887 }
 0xe48   :  { %594 = vrot.lane.b32.xlu1 %v888_v10, %s983_s13 }
 0xe49   :  { %v890_v17 = vpop.eup %889 }
 0xe4a   :  { %v575_v18 = vadd.f32 1.0, %v890_v17 }
 0xe4c   :  { %v753_v11 = vpop.f32.mrf.mxu3  ;;  %891 = vrcp.f32 %v575_v18  ;;  %v587_v23 = vand.u32 2147483648, %v575_v18  ;;  %vm581_vm15 = vweird.f32 %v575_v18  ;;  %v585_v24 = vand.u32 2147483647, %v575_v18 }
 0xe4d   :  { %v754_v14 = vadd.f32 %v1203_v44, %v753_v11 }
 0xe4e   :  { %v588_v26 = vor.u32 1.1754944e-38, %v587_v23  ;;  %vm586_vm2 = vcmp.eq.f32.partialorder %v585_v24, 8.507059e+37 }
 0xe4f   :  { %767 = vst [vmem:[#allocation8 + $0x28] sm:$0xff] %v754_v14 }
 0xe52   :  { %v892_v19 = vpop.eup %891 }
 0xe53   :  { %v577_v20 = vmul.f32 %v892_v19, %v575_v18  ;;  %vm582_vm14 = vweird.f32 %v892_v19 }
 0xe54   :  { %vm583_vm1 = vmor %vm581_vm15, %vm582_vm14 }
 0xe55   :  { %v578_v21 = vsub.f32 1.0, %v577_v20 }
 0xe57   :  { %v579_v22 = vmul.f32 %v892_v19, %v578_v21 }
 0xe59   :  { %v580_v12 = vadd.f32 %v892_v19, %v579_v22 }
 0xe5b   :  { %v584_v25 = vsel %vm583_vm1, %v892_v19, %v580_v12 }
 0xe5c   :  { %v589_v28 = vsel %vm586_vm2, %v588_v26, %v584_v25 }
 0xe5d   :  { %v592_v30 = vmul.f32 %v589_v28, %v536_v1 }
 0xeba   :  { %v595_v27 = vpop.permute.xlu1 %594 }
 0xebb   :  { %v597_v29 = vmul.f32 %v595_v27, %v589_v28 }
 0xebd   :  { %599 = vrot.lane.b32.xlu2 %v597_v29, %s983_s13 }
 0xf17   :  { %v600_v31 = vpop.permute.xlu2 %599 }
 0xf18   :  { %v602_v32 = vadd.f32 %v600_v31, %v592_v30 }
 0xf1a   :  { %893 = vtanh.f32 %v602_v32 }
 0xf20   :  { %v894_v33 = vpop.eup %893 }
 0xf21   :  { %605 = vrot.lane.b32.xlu0 %v894_v33, %s983_s13 }
 0xf93   :  { %v606_v34 = vpop.permute.xlu0 %605 }
 0xf94   :  { %v608_v35 = vmul.f32 %v606_v34, %v589_v28 }
 0xf96   :  { %610 = vrot.lane.b32.xlu1 %v608_v35, %s984_s5 }
0x1008   :  { %v611_v36 = vpop.permute.xlu1 %610 }
0x1009   :  { %613 = vst.msk [vmem:[#allocation2 + $0x30] sm:$0xff] %vm215_vm5, %v611_v36  ;;  %812 = vmatmul.msk.f32.vlgmr.msra.gmra.mxu2 %vm74_vm0, %v611_v36 }
0x100a   :  { %614 = vst.msk [vmem:[#allocation2 + $0x8] sm:$0xff] %vm217_vm6, %v611_v36 }
0x1010   :  { %v687_v37 = vld [vmem:[#allocation2 + $0x30] sm:$0xff] }
0x1011   :  { %820 = vmatmul.msk.f32.gmra.mxu3 %vm74_vm0, %v687_v37  ;;  %v682_v3 = vld [vmem:[#allocation2 + $0x8] sm:$0xff] }
0x108c   :  { %v634_v39 = vpop.f32.mrf.mxu2 }
0x108d   :  { %v637_v40 = vadd.f32 %v634_v39, %v138_v38 }
0x108f   :  { %895 = vtanh.f32 %v637_v40  ;;  %v813_v45 = vmul.f32 -1.442695, %v637_v40 }
0x1091   :  { %897 = vpow2.f32 %v813_v45 }
0x1094   :  { %v756_v41 = vpop.f32.mrf.mxu3 }
0x1095   :  { %v896_v42 = vpop.eup %895  ;;  %v757_v43 = vadd.f32 %v1203_v44, %v756_v41 }
0x1096   :  { %660 = vrot.lane.b32.xlu2 %v896_v42, %s983_s13 }
0x1097   :  { %768 = vst [vmem:[#allocation8 + $0x30] sm:$0xff] %v757_v43  ;;  %v898_v46 = vpop.eup %897 }
0x1098   :  { %v641_v47 = vadd.f32 1.0, %v898_v46 }
0x109a   :  { %899 = vrcp.f32 %v641_v47  ;;  %v653_v15 = vand.u32 2147483648, %v641_v47  ;;  %vm647_vm4 = vweird.f32 %v641_v47  ;;  %v651_v52 = vand.u32 2147483647, %v641_v47 }
0x109c   :  { %v654_v54 = vor.u32 1.1754944e-38, %v653_v15  ;;  %vm652_vm8 = vcmp.eq.f32.partialorder %v651_v52, 8.507059e+37 }
0x10a0   :  { %v900_v48 = vpop.eup %899 }
0x10a1   :  { %v643_v49 = vmul.f32 %v900_v48, %v641_v47  ;;  %vm648_vm3 = vweird.f32 %v900_v48 }
0x10a2   :  { %vm649_vm7 = vmor %vm647_vm4, %vm648_vm3 }
0x10a3   :  { %v644_v50 = vsub.f32 1.0, %v643_v49 }
0x10a5   :  { %v645_v51 = vmul.f32 %v900_v48, %v644_v50 }
0x10a7   :  { %v646_v13 = vadd.f32 %v900_v48, %v645_v51 }
0x10a9   :  { %v650_v53 = vsel %vm649_vm7, %v900_v48, %v646_v13 }
0x10aa   :  { %v655_v56 = vsel %vm652_vm8, %v654_v54, %v650_v53 }
0x10ab   :  { %v658_v58 = vmul.f32 %v655_v56, %v602_v32 }
0x10f0   :  { %v661_v55 = vpop.permute.xlu2 %660 }
0x10f1   :  { %v663_v57 = vmul.f32 %v661_v55, %v655_v56 }
0x10f3   :  { %665 = vrot.lane.b32.xlu0 %v663_v57, %s983_s13 }
0x1165   :  { %v666_v59 = vpop.permute.xlu0 %665 }
0x1166   :  { %v668_v60 = vadd.f32 %v666_v59, %v658_v58 }
0x1168   :  { %901 = vtanh.f32 %v668_v60 }
0x116e   :  { %v902_v61 = vpop.eup %901 }
0x116f   :  { %671 = vrot.lane.b32.xlu1 %v902_v61, %s983_s13 }
0x11e1   :  { %v672_v62 = vpop.permute.xlu1 %671 }
0x11e2   :  { %v674_v63 = vmul.f32 %v672_v62, %v655_v56 }
0x11e4   :  { %676 = vrot.lane.b32.xlu2 %v674_v63, %s984_s5 }
0x123e   :  { %v677_v0 = vpop.permute.xlu2 %676 }
0x123f   :  { %679 = vst.msk [vmem:[#allocation2 + $0x38] sm:$0xff] %vm215_vm5, %v677_v0 }
0x1240   :  { %680 = vst.msk [vmem:[#allocation2] sm:$0xff] %vm217_vm6, %v677_v0 }
0x1246   :  { %v688_v1 = vld [vmem:[#allocation2 + $0x38] sm:$0xff] }
0x1247   :  { %v681_v2 = vld [vmem:[#allocation2] sm:$0xff]  ;;  %821 = vmatmul.msk.f32.gmra.mxu3 %vm74_vm0, %v688_v1 }
0x1248   :  { %814 = vmatmul.msk.f32.vlgmr.msra.gmra.mxu1 %vm74_vm0, %v681_v2 }
0x1250   :  { %815 = vmatmul.msk.f32.gmra.mxu1 %vm74_vm0, %v682_v3 }
0x1258   :  { %816 = vmatmul.msk.f32.gmra.mxu1 %vm74_vm0, %v683_v4 }
0x1260   :  { %817 = vmatmul.msk.f32.gmra.mxu1 %vm74_vm0, %v684_v5 }
0x12c5   :  { %v738_v6 = vpop.f32.mrf.mxu1 }
0x12c6   :  { %v739_v7 = vadd.f32 %v1203_v44, %v738_v6 }
0x12c8   :  { %762 = vst [vmem:[#allocation8] sm:$0xff] %v739_v7 }
0x12ca   :  { %v759_v8 = vpop.f32.mrf.mxu3 }
0x12cb   :  { %v760_v9 = vadd.f32 %v1203_v44, %v759_v8 }
0x12cd   :  { %769 = vst [vmem:[#allocation8 + $0x38] sm:$0xff] %v760_v9  ;;  %v741_v10 = vpop.f32.mrf.mxu1 }
0x12ce   :  { %v742_v11 = vadd.f32 %v1203_v44, %v741_v10 }
0x12d0   :  { %763 = vst [vmem:[#allocation8 + $0x8] sm:$0xff] %v742_v11 }
0x12d5   :  { %v744_v14 = vpop.f32.mrf.mxu1 }
0x12d6   :  { %v745_v16 = vadd.f32 %v1203_v44, %v744_v14 }
0x12d8   :  { %764 = vst [vmem:[#allocation8 + $0x10] sm:$0xff] %v745_v16 }
0x12dd   :  { %v747_v17 = vpop.f32.mrf.mxu1 }
0x12de   :  { %v748_v18 = vadd.f32 %v1203_v44, %v747_v17 }
0x12e0   :  { %765 = vst [vmem:[#allocation8 + $0x18] sm:$0xff] %v748_v18 }
0x12e1   :  { %782 = dma.vmem_to_hbm [thread:$0]  %s775_s30, 1024, %s777_s10, [#allocation5], %s986_s11, %s986_s11, %s987_s4  }
0x12e2   :  { %979 = dma.done.wait [#allocation5], 1024  }
0x12e3   :  { %980 = vsyncadd [#allocation5], 4294966272 }
0x12e4   :  { %787 = vsyncpa [#allocation4], 1 }
0x12e5   :  { %788 = vsyncpa [#allocation7], 1 }
0x12e6   :  { %789 = vsyncpa [#allocation5], 1 }

</bundles_post_ra>
